<compile_context>
chip_gen: v7x
topology: tpu7x:2x2x1
jax: 0.10.0
libtpu: 0.0.40
codegen_flags: <defaults>
</compile_context>

<pallas_src>
import jax
import jax.numpy as jnp
import numpy as np
from jax.experimental import pallas as pl
from jax.experimental.pallas import tpu as pltpu

LAM = 0.5
NUM_CLASSES = 16
LANES = 128


def _largest_divisor(n, cap, granule):
    """Largest divisor of n that is <= cap and a multiple of `granule`.
    Falls back to n itself (block == full dim is always legal)."""
    if n <= cap:
        return n
    for d in range(cap, 0, -1):
        if n % d == 0 and d % granule == 0:
            return d
    return n


# ---------------------------------------------------------------------------
# Kernel 1: tiled linear head  y = x_flat @ W_pad + b_pad  (f32 MXU accum)
# ---------------------------------------------------------------------------
def _matmul_bias_kernel(x_ref, w_ref, b_ref, y_ref, acc_ref):
    @pl.when(pl.program_id(1) == 0)
    def _init():
        acc_ref[...] = jnp.zeros_like(acc_ref)

    acc_ref[...] += jnp.dot(x_ref[...], w_ref[...],
                            preferred_element_type=jnp.float32)

    @pl.when(pl.program_id(1) == pl.num_programs(1) - 1)
    def _finalize():
        # Bias folded in here (exact for mixup: lam + (1-lam) = 1 on bias).
        y_ref[...] = acc_ref[...] + b_ref[...]


def linear_logits(x_flat, w_pad, b_pad):
    B, D = x_flat.shape
    npad = w_pad.shape[1]
    tb = _largest_divisor(B, 256, 8)        # batch tile
    tk = _largest_divisor(D, 1024, 128)     # reduction (feature) tile
    grid = (B // tb, D // tk)               # reduction axis last
    cost = pl.CostEstimate(
        flops=2 * B * D * npad,
        transcendentals=0,
        bytes_accessed=(B * D + D * npad + B * npad + npad) * 4,
    )
    # NOTE: for bf16 activations/weights (MXU fast path + half the HBM bytes)
    # cast the jnp.dot operands to bf16 and keep f32 accumulation; kept f32
    # here so the demo matches the f32 reference at rtol=1e-4.
    return pl.pallas_call(
        _matmul_bias_kernel,
        out_shape=jax.ShapeDtypeStruct((B, npad), jnp.float32),
        grid_spec=pltpu.PrefetchScalarGridSpec(
            num_scalar_prefetch=0,
            grid=grid,
            in_specs=[pl.BlockSpec((tb, tk), lambda i, k: (i, k)),
                      pl.BlockSpec((tk, npad), lambda i, k: (k, 0)),
                      pl.BlockSpec((1, npad), lambda i, k: (0, 0))],
            out_specs=pl.BlockSpec((tb, npad), lambda i, k: (i, 0)),
            scratch_shapes=[pltpu.VMEM((tb, npad), jnp.float32)],
        ),
        compiler_params=pltpu.CompilerParams(
            dimension_semantics=("parallel", "arbitrary")),
        cost_estimate=cost,
    )(x_flat, w_pad, b_pad)


# ---------------------------------------------------------------------------
# Kernel 2: batch-tiled mixed cross-entropy on the tiny [B, 128] logits
#   logits = lam*y + (1-lam)*y[perm]          (bias already inside y)
#   loss   = mean_i [ lam*CE(logits_i, t_i) + (1-lam)*CE(logits_i, t_perm_i) ]
# Scalar loss accumulated into a resident SMEM (1,1) output across the grid.
# ---------------------------------------------------------------------------
def _make_mix_ce_kernel(inv_b):
    def kernel(ya_ref, yb_ref, ta_ref, tb_ref, o_ref):
        @pl.when(pl.program_id(0) == 0)
        def _init():
            o_ref[0, 0] = 0.0

        ya = ya_ref[...]                                 # (tb, NPAD) f32
        yb = yb_ref[...]
        rows, npad = ya.shape
        logits = LAM * ya + (1.0 - LAM) * yb
        classes = jax.lax.broadcasted_iota(jnp.int32, (rows, npad), 1)
        valid = classes < NUM_CLASSES
        logits = jnp.where(valid, logits, -1e30)         # mask lane padding
        m = jnp.max(logits, axis=-1, keepdims=True)
        lse = m + jnp.log(jnp.sum(jnp.exp(logits - m), axis=-1, keepdims=True))
        onehot_a = (classes == ta_ref[...]).astype(jnp.float32)
        onehot_b = (classes == tb_ref[...]).astype(jnp.float32)
        pick_a = jnp.sum(logits * onehot_a, axis=-1, keepdims=True)
        pick_b = jnp.sum(logits * onehot_b, axis=-1, keepdims=True)
        per_sample = LAM * (lse - pick_a) + (1.0 - LAM) * (lse - pick_b)
        # Partial lam-weighted mean; equals F.cross_entropy's batch mean overall.
        o_ref[0, 0] += jnp.sum(per_sample) * inv_b
    return kernel


def mixed_cross_entropy(y, y_perm, targets_a, targets_b):
    B, npad = y.shape
    tb = _largest_divisor(B, 512, 8)        # batch tile for the epilogue
    grid = (B // tb,)
    kernel = _make_mix_ce_kernel(1.0 / B)
    out = pl.pallas_call(
        kernel,
        out_shape=jax.ShapeDtypeStruct((1, 1), jnp.float32),
        grid_spec=pltpu.PrefetchScalarGridSpec(
            num_scalar_prefetch=0,
            grid=grid,
            in_specs=[pl.BlockSpec((tb, npad), lambda i: (i, 0)),
                      pl.BlockSpec((tb, npad), lambda i: (i, 0)),
                      pl.BlockSpec((tb, 1), lambda i: (i, 0)),
                      pl.BlockSpec((tb, 1), lambda i: (i, 0))],
            out_specs=pl.BlockSpec(memory_space=pltpu.MemorySpace.SMEM),
        ),
        compiler_params=pltpu.CompilerParams(
            dimension_semantics=("arbitrary",)),
    )(y, y_perm,
      targets_a[:, None].astype(jnp.int32),
      targets_b[:, None].astype(jnp.int32))
    return out[0, 0]


# ---------------------------------------------------------------------------
# Mixup.forward
# ---------------------------------------------------------------------------
def mixup_forward(inputs, targets, perm, w, b):
    B = inputs.shape[0]
    D = int(np.prod(inputs.shape[1:]))
    n_cls = w.shape[1]
    npad = ((n_cls + LANES - 1) // LANES) * LANES

    x_flat = inputs.reshape(B, D)                        # free NCHW flatten
    w_pad = jnp.zeros((D, npad), jnp.float32).at[:, :n_cls].set(
        w.astype(jnp.float32))
    b_pad = jnp.zeros((1, npad), jnp.float32).at[:, :n_cls].set(
        b.reshape(1, n_cls).astype(jnp.float32))

    # Linear head applied ONCE to the un-mixed x; mixup applied to the tiny
    # logits (exact for an affine head).
    y = linear_logits(x_flat, w_pad, b_pad)              # (B, npad), bias included
    y_perm = y[perm]                                     # tiny [B,128] gather (glue)
    targets_b = targets[perm]
    return mixed_cross_entropy(y, y_perm, targets, targets_b)


# ---------------------------------------------------------------------------
# Pure-JAX reference (computes the original way: mix inputs, then model, then CE)
# ---------------------------------------------------------------------------
def _reference(inputs, targets, perm, w, b):
    B = inputs.shape[0]
    mix = LAM * inputs + (1.0 - LAM) * inputs[perm]
    logits = mix.reshape(B, -1) @ w + b
    logp = jax.nn.log_softmax(logits, axis=-1)
    nll_a = -jnp.take_along_axis(logp, targets[:, None], axis=-1)[:, 0]
    nll_b = -jnp.take_along_axis(logp, targets[perm][:, None], axis=-1)[:, 0]
    return LAM * jnp.mean(nll_a) + (1.0 - LAM) * jnp.mean(nll_b)


if __name__ == "__main__":
    B, C, H, W = 2, 4, 16, 16
    D = C * H * W

    key = jax.random.PRNGKey(0)
    k_x, k_t, k_p, k_w, k_b = jax.random.split(key, 5)

    inputs = jax.random.normal(k_x, (B, C, H, W), dtype=jnp.float32)
    targets = jax.random.randint(k_t, (B,), 0, NUM_CLASSES, dtype=jnp.int32)
    perm = jax.random.permutation(k_p, B).astype(jnp.int32)   # torch.randperm

    # Deterministic synthetic "model" parameters (linear head).
    w = (jax.random.normal(k_w, (D, NUM_CLASSES), dtype=jnp.float32)
         * (1.0 / np.sqrt(D)))
    b = jax.random.normal(k_b, (1, NUM_CLASSES), dtype=jnp.float32) * 0.01

    loss = jax.block_until_ready(mixup_forward(inputs, targets, perm, w, b))
    ref = jax.block_until_ready(_reference(inputs, targets, perm, w, b))

    assert np.isfinite(float(loss))
    np.testing.assert_allclose(float(loss), float(ref), rtol=1e-4, atol=1e-4)
    print("KERNEL_OK")
</pallas_src>

<mosaic_0001>
module attributes {stable_mosaic.version = 11 : i64} {
  func.func @_matmul_bias_kernel(%arg0: i32, %arg1: i32, %arg2: memref<2x1024xf32, #tpu.memory_space<vmem>>, %arg3: memref<1024x128xf32, #tpu.memory_space<vmem>>, %arg4: memref<1x128xf32, #tpu.memory_space<vmem>>, %arg5: memref<2x128xf32, #tpu.memory_space<vmem>>, %arg6: memref<2x128xf32, #tpu.memory_space<vmem>>) attributes {dimension_semantics = [#tpu.dimension_semantics<parallel>, #tpu.dimension_semantics<arbitrary>], iteration_bounds = array<i64: 1, 1>, scalar_prefetch = 0 : i64, scratch_operands = 1 : i64, tpu.core_type = #tpu.core_type<tc>, window_params = [{transform_indices = @transform_0, window_bounds = array<i64: 2, 1024>}, {transform_indices = @transform_1, window_bounds = array<i64: 1024, 128>}, {pipeline_mode = #tpu.pipeline_mode<synchronous>, transform_indices = @transform_2, window_bounds = array<i64: 1, 128>}, {transform_indices = @transform_3, window_bounds = array<i64: 2, 128>}]} {
    %c0_i32 = arith.constant 0 : i32
    %0 = arith.cmpi eq, %arg1, %c0_i32 : i32
    %1 = arith.extui %0 : i1 to i32
    %c0_i32_0 = arith.constant 0 : i32
    %2 = arith.cmpi ne, %1, %c0_i32_0 : i32
    scf.if %2 {
      %cst_10 = arith.constant 0.000000e+00 : f32
      %12 = vector.broadcast %cst_10 : f32 to vector<2x128xf32>
      %c0_11 = arith.constant 0 : index
      %c0_12 = arith.constant 0 : index
      %13 = vector.load %arg6[%c0_11, %c0_12] : memref<2x128xf32, #tpu.memory_space<vmem>>, vector<2x128xf32>
      tpu.vector_store %arg6[%c0_11, %c0_12], %12 {strides = array<i32>} : memref<2x128xf32, #tpu.memory_space<vmem>>, vector<2x128xf32>,
    } else {
    }
    %c0 = arith.constant 0 : index
    %c0_1 = arith.constant 0 : index
    %3 = vector.load %arg6[%c0, %c0_1] : memref<2x128xf32, #tpu.memory_space<vmem>>, vector<2x128xf32>
    %c0_2 = arith.constant 0 : index
    %c0_3 = arith.constant 0 : index
    %4 = vector.load %arg2[%c0_2, %c0_3] : memref<2x1024xf32, #tpu.memory_space<vmem>>, vector<2x1024xf32>
    %c0_4 = arith.constant 0 : index
    %c0_5 = arith.constant 0 : index
    %5 = vector.load %arg3[%c0_4, %c0_5] : memref<1024x128xf32, #tpu.memory_space<vmem>>, vector<1024x128xf32>
    %cst = arith.constant dense<0.000000e+00> : vector<2x128xf32>
    %6 = tpu.matmul %4, %5, %cst {dimension_numbers = #tpu.dot_dimension_numbers<[1], [0], [0], [1], [0, 0, 1, 1], [], []>} : vector<2x1024xf32>, vector<1024x128xf32>, vector<2x128xf32> -> vector<2x128xf32>
    %7 = arith.addf %3, %6 : vector<2x128xf32>
    %c0_6 = arith.constant 0 : index
    %c0_7 = arith.constant 0 : index
    %8 = vector.load %arg6[%c0_6, %c0_7] : memref<2x128xf32, #tpu.memory_space<vmem>>, vector<2x128xf32>
    tpu.vector_store %arg6[%c0_6, %c0_7], %7 {strides = array<i32>} : memref<2x128xf32, #tpu.memory_space<vmem>>, vector<2x128xf32>,
    %c0_i32_8 = arith.constant 0 : i32
    %9 = arith.cmpi eq, %arg1, %c0_i32_8 : i32
    %10 = arith.extui %9 : i1 to i32
    %c0_i32_9 = arith.constant 0 : i32
    %11 = arith.cmpi ne, %10, %c0_i32_9 : i32
    scf.if %11 {
      %c0_10 = arith.constant 0 : index
      %c0_11 = arith.constant 0 : index
      %12 = vector.load %arg6[%c0_10, %c0_11] : memref<2x128xf32, #tpu.memory_space<vmem>>, vector<2x128xf32>
      %c0_12 = arith.constant 0 : index
      %c0_13 = arith.constant 0 : index
      %13 = vector.load %arg4[%c0_12, %c0_13] : memref<1x128xf32, #tpu.memory_space<vmem>>, vector<1x128xf32>
      %14 = vector.broadcast %13 : vector<1x128xf32> to vector<2x128xf32>
      %15 = arith.addf %12, %14 : vector<2x128xf32>
      %c0_14 = arith.constant 0 : index
      %c0_15 = arith.constant 0 : index
      %16 = vector.load %arg5[%c0_14, %c0_15] : memref<2x128xf32, #tpu.memory_space<vmem>>, vector<2x128xf32>
      tpu.vector_store %arg5[%c0_14, %c0_15], %15 {strides = array<i32>} : memref<2x128xf32, #tpu.memory_space<vmem>>, vector<2x128xf32>,
    } else {
    }
    return
  }
  func.func @transform_0(%arg0: i32, %arg1: i32) -> (i32, i32) {
    %c0_i32 = arith.constant 0 : i32
    return %arg0, %arg1 : i32, i32
  }
  func.func @transform_1(%arg0: i32, %arg1: i32) -> (i32, i32) {
    %c0_i32 = arith.constant 0 : i32
    %c0_i32_0 = arith.constant 0 : i32
    return %arg1, %c0_i32 : i32, i32
  }
  func.func @transform_2(%arg0: i32, %arg1: i32) -> (i32, i32) {
    %c0_i32 = arith.constant 0 : i32
    %c0_i32_0 = arith.constant 0 : i32
    %c0_i32_1 = arith.constant 0 : i32
    return %c0_i32, %c0_i32_0 : i32, i32
  }
  func.func @transform_3(%arg0: i32, %arg1: i32) -> (i32, i32) {
    %c0_i32 = arith.constant 0 : i32
    %c0_i32_0 = arith.constant 0 : i32
    return %arg0, %c0_i32 : i32, i32
  }
}

</mosaic_0001>

<bundles_post_ra>
// kernel: tpu_custom_call.1
= control target key start
LH: loop header
LB: loop body
LE: loop exit
PB: predicated region body
PF: predicated region fallthrough
CT: control target
= control target key end

     0   :  { %8 = vsyncpa [#allocation4], 0  ;;  %s966_s0 = inlined_call_operand.hbm [shape: f32[2,1024], index: 0, kind: input, shape index: {}]   ;;  %s967_s1 = inlined_call_operand.hbm [shape: f32[1024,128], index: 1, kind: input, shape index: {}]   ;;  %s968_s2 = inlined_call_operand.vmem [shape: f32[1,128], index: 2, kind: input, shape index: {}]   ;;  %s969_s3 = inlined_call_operand.hbm [shape: f32[2,128], index: 3, kind: output, shape index: {}]  }
   0x1   :  { %9 = vsyncpa [#allocation7], 0 }
   0x2   :  { %10 = vsyncpa [#allocation5], 0  ;;  %s882_s12 = smov [#allocation3]   ;;  %s883_s14 = smov [#allocation6]  }
   0x3   :  { %s17_s13 = sshll.u32 %s882_s12, 4  ;;  %s26_s15 = sshll.u32 %s883_s14, 4  ;;  %s18_s13 = int_to_ptr.vmem [resolvable:$true] %s17_s13  ;;  %s909_s15 = int_to_ptr.vmem [resolvable:$true] %s26_s15 }
   0x4   :  { %s810_s18 = scalar_lea.hbm %s966_s0, 256 }
   0x5   :  { %p811_p0 = scmp.ne.s32.totalorder %s966_s0, %s810_s18  ;;  %p814_p1 = scmp.lt.u32.totalorder %s810_s18, %s966_s0 }
   0x7   :  { %p816_p2 = pnand %p814_p1, %p811_p0 }
   0x9   :  { %819 = shalt.err (!%p816_p2)
}
   0xa   :  { %s820_s23 = scalar_lea.vmem %s18_s13, 256  ;;  %p825_p4 = scmp.lt.s32.totalorder %s18_s13, %s18_s13 }
   0xb   :  { %p821_p3 = scmp.ne.s32.totalorder %s18_s13, %s820_s23  ;;  %p826_p5 = scmp.lt.s32.totalorder %s820_s23, %s820_s23 }
   0xd   :  { %p827_p6 = por %p826_p5, %p825_p4 }
   0xf   :  { %p828_p7 = pnand %p827_p6, %p821_p3 }
  0x11   :  { %831 = shalt.err (!%p828_p7)
}
  0x12   :  { %20 = dma.hbm_to_vmem [thread:$0]  %s966_s0, 256, %s18_s13, [#allocation4]  }
  0x13   :  { %s832_s28 = scalar_lea.hbm %s967_s1, 16384 }
  0x14   :  { %p833_p8 = scmp.ne.s32.totalorder %s967_s1, %s832_s28  ;;  %p836_p9 = scmp.lt.u32.totalorder %s832_s28, %s967_s1 }
  0x16   :  { %p838_p10 = pnand %p836_p9, %p833_p8 }
  0x18   :  { %841 = shalt.err (!%p838_p10)
}
  0x19   :  { %s842_s6 = scalar_lea.vmem %s909_s15, 16384  ;;  %p847_p12 = scmp.lt.s32.totalorder %s909_s15, %s909_s15 }
  0x1a   :  { %p843_p11 = scmp.ne.s32.totalorder %s909_s15, %s842_s6  ;;  %p848_p13 = scmp.lt.s32.totalorder %s842_s6, %s842_s6 }
  0x1c   :  { %p849_p0 = por %p848_p13, %p847_p12 }
  0x1e   :  { %p850_p1 = pnand %p849_p0, %p843_p11 }
  0x20   :  { %853 = shalt.err (!%p850_p1)
}
  0x21   :  { %s884_s0 = smov 128   ;;  %s885_s7 = smov 8  }
  0x22   :  { %32 = dma.hbm_to_vmem [thread:$0]  %s967_s1, 16384, %s909_s15, [#allocation7], %s884_s0, %s884_s0, %s885_s7  }
  0x23   :  { %876 = dma.done.wait [#allocation4], 256  }
  0x24   :  { %877 = vsyncadd [#allocation4], 4294967040 }
  0x25   :  { %878 = dma.done.wait [#allocation7], 16384  }
  0x26   :  { %879 = vsyncadd [#allocation7], 4294950912  ;;  %v65_v0 = vld [vmem:[#allocation6 + $0x80] sm:$0xff]  ;;  %v66_v1 = vld [vmem:[#allocation6 + $0x88] sm:$0xff]  ;;  %v886_v47 = vmov 1983009808   ;;  %v183_v49 = vlaneseq }
  0x27   :  { %v97_v2 = vld [vmem:[#allocation6 + $0x180] sm:$0xff]  ;;  %v673_v3 = vpack.c.bf16 %v66_v1, %v65_v0  ;;  %v98_v4 = vld [vmem:[#allocation6 + $0x188] sm:$0xff]  ;;  %v67_v11 = vld [vmem:[#allocation6 + $0x90] sm:$0xff]  ;;  %v181_v48 = vunpack.c.l.s4 %v886_v47  ;;  %s888_s11 = smov [#allocation8]  }
  0x28   :  { %v49_v5 = vld [vmem:[#allocation6] sm:$0xff]  ;;  %v50_v6 = vld [vmem:[#allocation6 + $0x8] sm:$0xff]  ;;  %v705_v7 = vpack.c.bf16 %v98_v4, %v97_v2  ;;  %v68_v13 = vld [vmem:[#allocation6 + $0x98] sm:$0xff]  ;;  %v184_v0 = vshrl.u32 %v183_v49, 7  ;;  %s522_s12 = sshll.u32 %s888_s11, 4  ;;  %s523_s12 = int_to_ptr.vmem [resolvable:$true] %s522_s12 }
  0x29   :  { %v675_v8 = vpack.c.bf16 %v50_v6, %v49_v5  ;;  %v81_v9 = vld [vmem:[#allocation6 + $0x100] sm:$0xff]  ;;  %v82_v10 = vld [vmem:[#allocation6 + $0x108] sm:$0xff]  ;;  %674 = vmatprep.subr.bf16.mxu0 %v673_v3  ;;  %v99_v14 = vld [vmem:[#allocation6 + $0x190] sm:$0xff]  ;;  %v677_v16 = vpack.c.bf16 %v68_v13, %v67_v11  ;;  %v182_v63 = vunpack.c.0.s8 %v181_v48  ;;  %s854_s13 = scalar_lea.vmem %s523_s12, 32  ;;  %p859_p3 = scmp.lt.s32.totalorder %s523_s12, %s523_s12 }
  0x2a   :  { %v707_v12 = vpack.c.bf16 %v82_v10, %v81_v9  ;;  %v100_v15 = vld [vmem:[#allocation6 + $0x198] sm:$0xff]  ;;  %706 = vmatprep.subr.bf16.mxu1 %v705_v7  ;;  %v51_v18 = vld [vmem:[#allocation6 + $0x10] sm:$0xff]  ;;  %v69_v23 = vld [vmem:[#allocation6 + $0xa0] sm:$0xff]  ;;  %p855_p2 = scmp.ne.s32.totalorder %s523_s12, %s854_s13  ;;  %p860_p4 = scmp.lt.s32.totalorder %s854_s13, %s854_s13 }
  0x2b   :  { %676 = vmatpush3.bf16.msra.mxu0 %v675_v8  ;;  %v709_v17 = vpack.c.bf16 %v100_v15, %v99_v14  ;;  %v52_v19 = vld [vmem:[#allocation6 + $0x18] sm:$0xff]  ;;  %v83_v20 = vld [vmem:[#allocation6 + $0x110] sm:$0xff]  ;;  %v70_v24 = vld [vmem:[#allocation6 + $0xa8] sm:$0xff]  ;;  %v940_v13 = vsub.s32 %v182_v63, %v184_v0 }
  0x2c   :  { %708 = vmatpush3.bf16.msra.mxu1 %v707_v12  ;;  %v679_v21 = vpack.c.bf16 %v52_v19, %v51_v18  ;;  %v84_v22 = vld [vmem:[#allocation6 + $0x118] sm:$0xff]  ;;  %678 = vmatprep.subr.bf16.mxu0 %v677_v16  ;;  %v681_v26 = vpack.c.bf16 %v70_v24, %v69_v23  ;;  %v101_v27 = vld [vmem:[#allocation6 + $0x1a0] sm:$0xff]  ;;  %v102_v28 = vld [vmem:[#allocation6 + $0x1a8] sm:$0xff]  ;;  %p861_p5 = por %p860_p4, %p859_p3 }
  0x2d   :  { %710 = vmatprep.subr.bf16.mxu1 %v709_v17  ;;  %v711_v25 = vpack.c.bf16 %v84_v22, %v83_v20  ;;  %v53_v29 = vld [vmem:[#allocation6 + $0x20] sm:$0xff]  ;;  %v713_v30 = vpack.c.bf16 %v102_v28, %v101_v27  ;;  %v54_v31 = vld [vmem:[#allocation6 + $0x28] sm:$0xff]  ;;  %v71_v35 = vld [vmem:[#allocation6 + $0xb0] sm:$0xff] }
  0x2e   :  { %v85_v32 = vld [vmem:[#allocation6 + $0x120] sm:$0xff]  ;;  %v86_v33 = vld [vmem:[#allocation6 + $0x128] sm:$0xff]  ;;  %v683_v34 = vpack.c.bf16 %v54_v31, %v53_v29  ;;  %v72_v36 = vld [vmem:[#allocation6 + $0xb8] sm:$0xff]  ;;  %p862_p6 = pnand %p861_p5, %p855_p2 }
  0x2f   :  { %680 = vmatpush3.bf16.msra.mxu0 %v679_v21  ;;  %v103_v37 = vld [vmem:[#allocation6 + $0x1b0] sm:$0xff]  ;;  %v715_v38 = vpack.c.bf16 %v86_v33, %v85_v32  ;;  %v685_v39 = vpack.c.bf16 %v72_v36, %v71_v35  ;;  %v104_v40 = vld [vmem:[#allocation6 + $0x1b8] sm:$0xff]  ;;  %v73_v46 = vld [vmem:[#allocation6 + $0xc0] sm:$0xff] }
  0x30   :  { %712 = vmatpush3.bf16.msra.mxu1 %v711_v25  ;;  %682 = vmatprep.subr.bf16.mxu0 %v681_v26  ;;  %v55_v41 = vld [vmem:[#allocation6 + $0x30] sm:$0xff]  ;;  %v56_v42 = vld [vmem:[#allocation6 + $0x38] sm:$0xff]  ;;  %v717_v43 = vpack.c.bf16 %v104_v40, %v103_v37  ;;  %v74_v50 = vld [vmem:[#allocation6 + $0xc8] sm:$0xff] }
  0x31   :  { %714 = vmatprep.subr.bf16.mxu1 %v713_v30  ;;  %v87_v44 = vld [vmem:[#allocation6 + $0x130] sm:$0xff]  ;;  %v88_v45 = vld [vmem:[#allocation6 + $0x138] sm:$0xff]  ;;  %v105_v51 = vld [vmem:[#allocation6 + $0x1c0] sm:$0xff]  ;;  %v687_v53 = vpack.c.bf16 %v56_v42, %v55_v41  ;;  %v689_v55 = vpack.c.bf16 %v74_v50, %v73_v46 }
  0x32   :  { %v106_v52 = vld [vmem:[#allocation6 + $0x1c8] sm:$0xff]  ;;  %v719_v54 = vpack.c.bf16 %v88_v45, %v87_v44  ;;  %v57_v56 = vld [vmem:[#allocation6 + $0x40] sm:$0xff]  ;;  %v75_v61 = vld [vmem:[#allocation6 + $0xd0] sm:$0xff] }
  0x33   :  { %684 = vmatpush3.bf16.msra.mxu0 %v683_v34  ;;  %v58_v57 = vld [vmem:[#allocation6 + $0x48] sm:$0xff]  ;;  %v89_v58 = vld [vmem:[#allocation6 + $0x140] sm:$0xff]  ;;  %v721_v59 = vpack.c.bf16 %v106_v52, %v105_v51  ;;  %v76_v62 = vld [vmem:[#allocation6 + $0xd8] sm:$0xff] }
  0x34   :  { %716 = vmatpush3.bf16.msra.mxu1 %v715_v38  ;;  %686 = vmatprep.subr.bf16.mxu0 %v685_v39  ;;  %v90_v60 = vld [vmem:[#allocation6 + $0x148] sm:$0xff]  ;;  %v107_v1 = vld [vmem:[#allocation6 + $0x1d0] sm:$0xff]  ;;  %v108_v2 = vld [vmem:[#allocation6 + $0x1d8] sm:$0xff]  ;;  %v691_v3 = vpack.c.bf16 %v58_v57, %v57_v56  ;;  %v693_v5 = vpack.c.bf16 %v76_v62, %v75_v61 }
  0x35   :  { %718 = vmatprep.subr.bf16.mxu1 %v717_v43  ;;  %v723_v4 = vpack.c.bf16 %v90_v60, %v89_v58  ;;  %v59_v6 = vld [vmem:[#allocation6 + $0x50] sm:$0xff]  ;;  %v60_v7 = vld [vmem:[#allocation6 + $0x58] sm:$0xff]  ;;  %v725_v9 = vpack.c.bf16 %v108_v2, %v107_v1  ;;  %v77_v11 = vld [vmem:[#allocation6 + $0xe0] sm:$0xff] }
  0x36   :  { %v91_v8 = vld [vmem:[#allocation6 + $0x150] sm:$0xff]  ;;  %v92_v10 = vld [vmem:[#allocation6 + $0x158] sm:$0xff]  ;;  %v78_v12 = vld [vmem:[#allocation6 + $0xe8] sm:$0xff]  ;;  %v695_v16 = vpack.c.bf16 %v60_v7, %v59_v6 }
  0x37   :  { %688 = vmatpush3.bf16.msra.mxu0 %v687_v53  ;;  %v109_v14 = vld [vmem:[#allocation6 + $0x1e0] sm:$0xff]  ;;  %v110_v15 = vld [vmem:[#allocation6 + $0x1e8] sm:$0xff]  ;;  %v727_v18 = vpack.c.bf16 %v92_v10, %v91_v8  ;;  %v697_v19 = vpack.c.bf16 %v78_v12, %v77_v11  ;;  %v47_v22 = vld [vmem:[#allocation3] sm:$0xff] }
  0x38   :  { %720 = vmatpush3.bf16.msra.mxu1 %v719_v54  ;;  %690 = vmatprep.subr.bf16.mxu0 %v689_v55  ;;  %v61_v17 = vld [vmem:[#allocation6 + $0x60] sm:$0xff]  ;;  %v62_v20 = vld [vmem:[#allocation6 + $0x68] sm:$0xff]  ;;  %v729_v23 = vpack.c.bf16 %v110_v15, %v109_v14  ;;  %v79_v25 = vld [vmem:[#allocation6 + $0xf0] sm:$0xff]  ;;  %v186_v27 = vrot.slane %v47_v22, %v940_v13  ;;  %v179_v28 = vcombine.high %v47_v22, %v47_v22 }
  0x39   :  { %722 = vmatprep.subr.bf16.mxu1 %v721_v59  ;;  %v93_v21 = vld [vmem:[#allocation6 + $0x160] sm:$0xff]  ;;  %v94_v24 = vld [vmem:[#allocation6 + $0x168] sm:$0xff]  ;;  %v80_v26 = vld [vmem:[#allocation6 + $0xf8] sm:$0xff]  ;;  %v699_v31 = vpack.c.bf16 %v62_v20, %v61_v17 }
  0x3a   :  { %v111_v29 = vld [vmem:[#allocation6 + $0x1f0] sm:$0xff]  ;;  %v112_v30 = vld [vmem:[#allocation6 + $0x1f8] sm:$0xff]  ;;  %v194_v32 = vcombine.high %v186_v27, %v186_v27  ;;  %v193_v33 = vrot.slane %v179_v28, %v940_v13  ;;  %v731_v34 = vpack.c.bf16 %v94_v24, %v93_v21  ;;  %v701_v35 = vpack.c.bf16 %v80_v26, %v79_v25  ;;  %v129_v42 = vld [vmem:[#allocation6 + $0x280] sm:$0xff] }
  0x3b   :  { %692 = vmatpush3.bf16.msra.mxu0 %v691_v3  ;;  %v63_v36 = vld [vmem:[#allocation6 + $0x70] sm:$0xff]  ;;  %v64_v37 = vld [vmem:[#allocation6 + $0x78] sm:$0xff]  ;;  %v733_v39 = vpack.c.bf16 %v112_v30, %v111_v29  ;;  %v130_v43 = vld [vmem:[#allocation6 + $0x288] sm:$0xff] }
  0x3c   :  { %724 = vmatpush3.bf16.msra.mxu1 %v723_v4  ;;  %694 = vmatprep.subr.bf16.mxu0 %v693_v5  ;;  %v95_v38 = vld [vmem:[#allocation6 + $0x170] sm:$0xff]  ;;  %v96_v40 = vld [vmem:[#allocation6 + $0x178] sm:$0xff]  ;;  %v195_v41 = vcombine.high %v193_v33, %v193_v33  ;;  %v161_v44 = vld [vmem:[#allocation6 + $0x380] sm:$0xff]  ;;  %v703_v46 = vpack.c.bf16 %v64_v37, %v63_v36  ;;  %v737_v48 = vpack.c.bf16 %v130_v43, %v129_v42 }
  0x3d   :  { %726 = vmatprep.subr.bf16.mxu1 %v725_v9  ;;  %285 = vmatprep.mubr.f32.mxu0 %v194_v32  ;;  %v162_v45 = vld [vmem:[#allocation6 + $0x388] sm:$0xff]  ;;  %v735_v47 = vpack.c.bf16 %v96_v40, %v95_v38  ;;  %v113_v49 = vld [vmem:[#allocation6 + $0x200] sm:$0xff]  ;;  %v131_v54 = vld [vmem:[#allocation6 + $0x290] sm:$0xff] }
  0x3e   :  { %355 = vmatprep.mubr.f32.mxu1 %v195_v41  ;;  %v114_v50 = vld [vmem:[#allocation6 + $0x208] sm:$0xff]  ;;  %v145_v51 = vld [vmem:[#allocation6 + $0x300] sm:$0xff]  ;;  %v769_v52 = vpack.c.bf16 %v162_v45, %v161_v44  ;;  %v132_v55 = vld [vmem:[#allocation6 + $0x298] sm:$0xff] }
  0x3f   :  { %696 = vmatpush3.bf16.msra.mxu0 %v695_v16  ;;  %v146_v53 = vld [vmem:[#allocation6 + $0x308] sm:$0xff]  ;;  %v163_v56 = vld [vmem:[#allocation6 + $0x390] sm:$0xff]  ;;  %v164_v57 = vld [vmem:[#allocation6 + $0x398] sm:$0xff]  ;;  %v739_v58 = vpack.c.bf16 %v114_v50, %v113_v49  ;;  %v741_v60 = vpack.c.bf16 %v132_v55, %v131_v54 }
  0x40   :  { %728 = vmatpush3.bf16.msra.mxu1 %v727_v18  ;;  %698 = vmatprep.subr.bf16.mxu0 %v697_v19  ;;  %v771_v59 = vpack.c.bf16 %v146_v53, %v145_v51  ;;  %v115_v61 = vld [vmem:[#allocation6 + $0x210] sm:$0xff]  ;;  %v116_v62 = vld [vmem:[#allocation6 + $0x218] sm:$0xff]  ;;  %v773_v0 = vpack.c.bf16 %v164_v57, %v163_v56  ;;  %v133_v2 = vld [vmem:[#allocation6 + $0x2a0] sm:$0xff] }
  0x41   :  { %730 = vmatprep.subr.bf16.mxu1 %v729_v23  ;;  %v147_v63 = vld [vmem:[#allocation6 + $0x310] sm:$0xff]  ;;  %v148_v1 = vld [vmem:[#allocation6 + $0x318] sm:$0xff]  ;;  %v134_v3 = vld [vmem:[#allocation6 + $0x2a8] sm:$0xff]  ;;  %v743_v6 = vpack.c.bf16 %v116_v62, %v115_v61 }
  0x42   :  { %v165_v4 = vld [vmem:[#allocation6 + $0x3a0] sm:$0xff]  ;;  %v166_v5 = vld [vmem:[#allocation6 + $0x3a8] sm:$0xff]  ;;  %v775_v7 = vpack.c.bf16 %v148_v1, %v147_v63  ;;  %v745_v8 = vpack.c.bf16 %v134_v3, %v133_v2  ;;  %v135_v15 = vld [vmem:[#allocation6 + $0x2b0] sm:$0xff] }
  0x43   :  { %700 = vmatpush3.bf16.msra.mxu0 %v699_v31  ;;  %v117_v9 = vld [vmem:[#allocation6 + $0x220] sm:$0xff]  ;;  %v118_v10 = vld [vmem:[#allocation6 + $0x228] sm:$0xff]  ;;  %v777_v12 = vpack.c.bf16 %v166_v5, %v165_v4  ;;  %v136_v16 = vld [vmem:[#allocation6 + $0x2b8] sm:$0xff] }
  0x44   :  { %732 = vmatpush3.bf16.msra.mxu1 %v731_v34  ;;  %702 = vmatprep.subr.bf16.mxu0 %v701_v35  ;;  %v149_v11 = vld [vmem:[#allocation6 + $0x320] sm:$0xff]  ;;  %v150_v14 = vld [vmem:[#allocation6 + $0x328] sm:$0xff]  ;;  %v167_v17 = vld [vmem:[#allocation6 + $0x3b0] sm:$0xff]  ;;  %v747_v19 = vpack.c.bf16 %v118_v10, %v117_v9  ;;  %v749_v21 = vpack.c.bf16 %v136_v16, %v135_v15 }
  0x45   :  { %734 = vmatprep.subr.bf16.mxu1 %v733_v39  ;;  %v168_v18 = vld [vmem:[#allocation6 + $0x3b8] sm:$0xff]  ;;  %v779_v20 = vpack.c.bf16 %v150_v14, %v149_v11  ;;  %v119_v22 = vld [vmem:[#allocation6 + $0x230] sm:$0xff]  ;;  %v138_v28 = vld [vmem:[#allocation6 + $0x2c8] sm:$0xff] }
  0x46   :  { %v120_v23 = vld [vmem:[#allocation6 + $0x238] sm:$0xff]  ;;  %v151_v24 = vld [vmem:[#allocation6 + $0x330] sm:$0xff]  ;;  %v781_v25 = vpack.c.bf16 %v168_v18, %v167_v17  ;;  %v169_v29 = vld [vmem:[#allocation6 + $0x3c0] sm:$0xff] }
  0x47   :  { %704 = vmatpush3.bf16.msra.mxu0 %v703_v46  ;;  %v152_v26 = vld [vmem:[#allocation6 + $0x338] sm:$0xff]  ;;  %v170_v30 = vld [vmem:[#allocation6 + $0x3c8] sm:$0xff]  ;;  %v751_v32 = vpack.c.bf16 %v120_v23, %v119_v22  ;;  %v121_v37 = vld [vmem:[#allocation6 + $0x240] sm:$0xff] }
  0x48   :  { %736 = vmatpush3.bf16.msra.mxu1 %v735_v47  ;;  %738 = vmatprep.subr.bf16.mxu0 %v737_v48  ;;  %v48_v31 = vld [vmem:[#allocation3 + $0x8] sm:$0xff]  ;;  %v783_v35 = vpack.c.bf16 %v152_v26, %v151_v24  ;;  %v122_v38 = vld [vmem:[#allocation6 + $0x248] sm:$0xff]  ;;  %v153_v39 = vld [vmem:[#allocation6 + $0x340] sm:$0xff]  ;;  %v785_v40 = vpack.c.bf16 %v170_v30, %v169_v29 }
  0x49   :  { %770 = vmatprep.subr.bf16.mxu1 %v769_v52  ;;  %v196_v34 = vcombine.high %v48_v31, %v48_v31  ;;  %v154_v41 = vld [vmem:[#allocation6 + $0x348] sm:$0xff]  ;;  %v139_v42 = vld [vmem:[#allocation6 + $0x2d0] sm:$0xff]  ;;  %v140_v43 = vld [vmem:[#allocation6 + $0x2d8] sm:$0xff]  ;;  %v755_v48 = vpack.c.bf16 %v122_v38, %v121_v37 }
  0x4a   :  { %286 = vmatmul.mubr.f32.vlgmr.msra.gmra.mrb[0].mxu0 %v186_v27  ;;  %v137_v27 = vld [vmem:[#allocation6 + $0x2c0] sm:$0xff]  ;;  %v171_v46 = vld [vmem:[#allocation6 + $0x3d0] sm:$0xff]  ;;  %v172_v47 = vld [vmem:[#allocation6 + $0x3d8] sm:$0xff]  ;;  %v787_v50 = vpack.c.bf16 %v154_v41, %v153_v39  ;;  %v757_v51 = vpack.c.bf16 %v140_v43, %v139_v42 }
  0x4b   :  { %356 = vmatmul.mubr.f32.vlgmr.msra.gmra.mrb[0].mxu1 %v193_v33  ;;  %740 = vmatpush3.bf16.msra.mxu0 %v739_v58  ;;  %v945_v33 = vrot.slane %v48_v31, %v940_v13  ;;  %v753_v36 = vpack.c.bf16 %v138_v28, %v137_v27  ;;  %v210_v45 = vrot.slane %v196_v34, %v940_v13  ;;  %v123_v52 = vld [vmem:[#allocation6 + $0x250] sm:$0xff]  ;;  %v124_v53 = vld [vmem:[#allocation6 + $0x258] sm:$0xff]  ;;  %v141_v57 = vld [vmem:[#allocation6 + $0x2e0] sm:$0xff] }
  0x4c   :  { %772 = vmatpush3.bf16.msra.mxu1 %v771_v59  ;;  %742 = vmatprep.subr.bf16.mxu0 %v741_v60  ;;  %v155_v54 = vld [vmem:[#allocation6 + $0x350] sm:$0xff]  ;;  %v789_v55 = vpack.c.bf16 %v172_v47, %v171_v46  ;;  %v156_v56 = vld [vmem:[#allocation6 + $0x358] sm:$0xff]  ;;  %v142_v58 = vld [vmem:[#allocation6 + $0x2e8] sm:$0xff]  ;;  %v759_v60 = vpack.c.bf16 %v124_v53, %v123_v52 }
  0x4d   :  { %774 = vmatprep.subr.bf16.mxu1 %v773_v0  ;;  %v211_v44 = vcombine.high %v945_v33, %v945_v33  ;;  %v212_v49 = vcombine.high %v210_v45, %v210_v45  ;;  %v173_v13 = vld [vmem:[#allocation6 + $0x3e0] sm:$0xff]  ;;  %v174_v59 = vld [vmem:[#allocation6 + $0x3e8] sm:$0xff]  ;;  %v791_v61 = vpack.c.bf16 %v156_v56, %v155_v54  ;;  %v761_v62 = vpack.c.bf16 %v142_v58, %v141_v57  ;;  %v143_v4 = vld [vmem:[#allocation6 + $0x2f0] sm:$0xff] }
  0x4e   :  { %v125_v63 = vld [vmem:[#allocation6 + $0x260] sm:$0xff]  ;;  %v126_v0 = vld [vmem:[#allocation6 + $0x268] sm:$0xff]  ;;  %v793_v2 = vpack.c.bf16 %v174_v59, %v173_v13  ;;  %v144_v5 = vld [vmem:[#allocation6 + $0x2f8] sm:$0xff] }
  0x4f   :  { %744 = vmatpush3.bf16.msra.mxu0 %v743_v6  ;;  %425 = vmatprep.mubr.f32.mxu0 %v211_v44  ;;  %v157_v1 = vld [vmem:[#allocation6 + $0x360] sm:$0xff]  ;;  %v158_v3 = vld [vmem:[#allocation6 + $0x368] sm:$0xff]  ;;  %v175_v6 = vld [vmem:[#allocation6 + $0x3f0] sm:$0xff]  ;;  %v765_v10 = vpack.c.bf16 %v144_v5, %v143_v4 }
  0x50   :  { %776 = vmatpush3.bf16.msra.mxu1 %v775_v7  ;;  %746 = vmatprep.subr.bf16.mxu0 %v745_v8  ;;  %v176_v7 = vld [vmem:[#allocation6 + $0x3f8] sm:$0xff]  ;;  %v763_v8 = vpack.c.bf16 %v126_v0, %v125_v63  ;;  %v795_v9 = vpack.c.bf16 %v158_v3, %v157_v1  ;;  %v127_v11 = vld [vmem:[#allocation6 + $0x270] sm:$0xff]  ;;  %v532_v37 = vld [vmem:[%s968_s2] ss:$0 sm:$0xff] }
  0x51   :  { %778 = vmatprep.subr.bf16.mxu1 %v777_v12  ;;  %495 = vmatprep.mubr.f32.mxu1 %v212_v49  ;;  %v128_v12 = vld [vmem:[#allocation6 + $0x278] sm:$0xff]  ;;  %v797_v14 = vpack.c.bf16 %v176_v7, %v175_v6  ;;  %v159_v15 = vld [vmem:[#allocation6 + $0x370] sm:$0xff] }
  0x52   :  { %v160_v16 = vld [vmem:[#allocation6 + $0x378] sm:$0xff]  ;;  %v767_v17 = vpack.c.bf16 %v128_v12, %v127_v11 }
  0x53   :  { %748 = vmatpush3.bf16.msra.mxu0 %v747_v19  ;;  %v799_v18 = vpack.c.bf16 %v160_v16, %v159_v15  ;;  %v887_v19 = vmov 0.0  }
  0x54   :  { %780 = vmatpush3.bf16.msra.mxu1 %v779_v20  ;;  %750 = vmatprep.subr.bf16.mxu0 %v749_v21  ;;  %45 = vst [vmem:[#allocation2] sm:$0x3] %v887_v19 }
  0x55   :  { %782 = vmatprep.subr.bf16.mxu1 %v781_v25 }
  0x57   :  { %752 = vmatpush3.bf16.msra.mxu0 %v751_v32 }
  0x58   :  { %784 = vmatpush3.bf16.msra.mxu1 %v783_v35  ;;  %754 = vmatprep.subr.bf16.mxu0 %v753_v36 }
  0x59   :  { %786 = vmatprep.subr.bf16.mxu1 %v785_v40 }
  0x5b   :  { %756 = vmatpush3.bf16.msra.mxu0 %v755_v48  ;;  %v46_v35 = vld [vmem:[#allocation2] sm:$0x3] }
  0x5c   :  { %788 = vmatpush3.bf16.msra.mxu1 %v787_v50  ;;  %758 = vmatprep.subr.bf16.mxu0 %v757_v51 }
  0x5d   :  { %790 = vmatprep.subr.bf16.mxu1 %v789_v55 }
  0x5f   :  { %760 = vmatpush3.bf16.msra.mxu0 %v759_v60 }
  0x60   :  { %792 = vmatpush3.bf16.msra.mxu1 %v791_v61  ;;  %762 = vmatprep.subr.bf16.mxu0 %v761_v62 }
  0x61   :  { %794 = vmatprep.subr.bf16.mxu1 %v793_v2 }
  0x63   :  { %764 = vmatpush3.bf16.msra.mxu0 %v763_v8 }
  0x64   :  { %796 = vmatpush3.bf16.msra.mxu1 %v795_v9  ;;  %766 = vmatprep.subr.bf16.mxu0 %v765_v10 }
  0x65   :  { %798 = vmatprep.subr.bf16.mxu1 %v797_v14 }
  0x67   :  { %768 = vmatpush3.bf16.msra.mxu0 %v767_v17 }
  0x68   :  { %800 = vmatpush3.bf16.msra.mxu1 %v799_v18 }
  0x6a   :  { %426 = vmatmul.mubr.f32.vlgmr.msra.gmra.mrb[2].mxu0 %v945_v33 }
  0x6b   :  { %496 = vmatmul.mubr.f32.vlgmr.msra.gmra.mrb[2].mxu1 %v210_v45 }
 0x11d   :  { %v565_v20 = vpop.f32.mrb[0].mxu0 }
 0x11e   :  { %v600_v21 = vpop.f32.mrb[0].mxu1  ;;  %v566_v22 = vpop.f32.mrb[1].mxu0 }
 0x11f   :  { %v567_v23 = vadd.f32 %v566_v22, %v565_v20  ;;  %v601_v24 = vpop.f32.mrb[1].mxu1 }
 0x120   :  { %v602_v25 = vadd.f32 %v601_v24, %v600_v21 }
 0x122   :  { %v358_v26 = vadd.f32 %v602_v25, %v567_v23 }
 0x13d   :  { %v635_v27 = vpop.f32.mrb[2].mxu0 }
 0x13e   :  { %v636_v28 = vpop.f32.mrb[3].mxu0  ;;  %v670_v29 = vpop.f32.mrb[2].mxu1 }
 0x13f   :  { %v637_v30 = vadd.f32 %v636_v28, %v635_v27  ;;  %v671_v31 = vpop.f32.mrb[3].mxu1 }
 0x140   :  { %v672_v32 = vadd.f32 %v671_v31, %v670_v29 }
 0x141   :  { %v428_v34 = vadd.f32 %v637_v30, %v358_v26 }
 0x143   :  { %v498_v36 = vadd.f32 %v672_v32, %v428_v34 }
 0x145   :  { %v501_v33 = vadd.f32 %v498_v36, %v46_v35 }
 0x147   :  { %502 = vst [vmem:[#allocation2] sm:$0x3] %v501_v33 }
 0x14e   :  { %v506_v38 = vld [vmem:[#allocation2] sm:$0x3] }
 0x14f   :  { %v514_v39 = vadd.f32 %v532_v37, %v506_v38 }
 0x151   :  { %515 = vst [vmem:[#allocation8] sm:$0x3] %v514_v39 }
 0x152   :  { %865 = shalt.err (!%p862_p6)
}
 0x153   :  { %s866_s16 = scalar_lea.hbm %s969_s3, 32 }
 0x154   :  { %p867_p7 = scmp.ne.s32.totalorder %s969_s3, %s866_s16  ;;  %p870_p8 = scmp.lt.u32.totalorder %s866_s16, %s969_s3 }
 0x156   :  { %p872_p9 = pnand %p870_p8, %p867_p7 }
 0x158   :  { %875 = shalt.err (!%p872_p9)
}
 0x159   :  { %525 = dma.vmem_to_hbm [thread:$0]  %s523_s12, 32, %s969_s3, [#allocation5]  }
 0x15a   :  { %880 = dma.done.wait [#allocation5], 32  }
 0x15b   :  { %881 = vsyncadd [#allocation5], 4294967264 }
 0x15c   :  { %529 = vsyncpa [#allocation4], 1 }
 0x15d   :  { %530 = vsyncpa [#allocation7], 1 }
 0x15e   :  { %531 = vsyncpa [#allocation5], 1 }

</bundles_post_ra>
